<compile_context>
chip_gen: v7x
topology: tpu7x:2x2x1
jax: 0.10.0
libtpu: 0.0.40
codegen_flags: <defaults>
</compile_context>

<pallas_src>
import functools

import jax
import jax.numpy as jnp
import numpy as np
from jax.experimental import pallas as pl
from jax.experimental.pallas import tpu as pltpu

K = 2     # number of flow steps
HD = 32   # hidden width of the affine-coupling net (1x1-conv MLP over channels)


# ----------------------------------------------------------------------------- kernel
def _glow_kernel(x_ref, wcat_ref, bcat_ref, w2T_ref, b2_ref, z_ref, ldrow_ref,
                 *, num_steps, ch_half, cs):
    x = x_ref[...].astype(jnp.float32)                    # (Cs, TM) transposed slab
    ld = jnp.zeros((1, x.shape[1]), jnp.float32)          # per-column sum(log_s)

    for k in range(num_steps):                            # static unroll over flow steps
        # ---- fused [actnorm -> 1x1 conv -> first coupling layer]: ONE MXU matmul ----
        #   rows 0:Cs      -> normalized + rotated x  (W'^T x + c)
        #   rows Cs:Cs+HD  -> pre-ReLU hidden of the coupling net
        y = jnp.dot(wcat_ref[k], x, preferred_element_type=jnp.float32) + bcat_ref[k]
        xa = y[:ch_half, :]                               # (Cs/2, TM)
        xb = y[ch_half:cs, :]                             # (Cs/2, TM)
        h = jnp.maximum(y[cs:, :], 0.0)                   # (HD, TM)

        # ---- second coupling layer + affine transform of xb ----
        st = jnp.dot(w2T_ref[k], h, preferred_element_type=jnp.float32) + b2_ref[k]
        log_s = jnp.tanh(st[:ch_half, :])                 # bounded log-scale
        t = st[ch_half:, :]
        xb = xb * jnp.exp(log_s) + t
        ld = ld + jnp.sum(log_s, axis=0, keepdims=True)   # data-dependent logdet term

        if k + 1 < num_steps:
            x = jnp.concatenate([xa, xb], axis=0)         # tile-aligned sublane concat
        else:
            # final step: write halves straight to the output (no extra concat copy)
            z_ref[:ch_half, :] = xa.astype(z_ref.dtype)
            z_ref[ch_half:, :] = xb.astype(z_ref.dtype)

    ldrow_ref[...] = ld


# ----------------------------------------------------------------------------- wrapper
def _round_up(x, m):
    return ((x + m - 1) // m) * m


def _pick_col_block(m_pad, target=8192):
    """m_pad is a multiple of 256; return a multiple of 128 that divides m_pad, is
    <= target, and is <= m_pad // 2 so the grid has >= 2 steps (pipelining / v7x)."""
    tm = min(target, m_pad // 2)
    tm -= tm % 128
    tm = max(tm, 128)
    while m_pad % tm != 0:
        tm -= 128
    return tm


def glow_flow_pallas(xt, params, P):
    """xt: (Cs, M) transposed slab with M = N*P. Returns z_t (Cs, M), logdet (N,)."""
    Cs, M = xt.shape
    N = M // P
    ch = Cs // 2
    logs, bias, Wm, logdetw, w1, b1, w2, b2 = params

    # --- hoist all data-independent work out of the kernel -------------------------
    s = jnp.exp(logs).reshape(K, Cs)                      # actnorm scale
    b = bias.reshape(K, Cs, 1)                            # actnorm bias (column)
    WmT = jnp.transpose(Wm, (0, 2, 1))                    # (K, Cs, Cs): x <- W^T x
    Wp = WmT * s[:, None, :]                              # actnorm folded: W'^T = W^T diag(s)
    c = jnp.einsum('kij,kjl->kil', Wp, b)                 # (K, Cs, 1):   c = W'^T b
    w1T = jnp.transpose(w1, (0, 2, 1))                    # (K, HD, Cs/2)
    # 1x1 conv fused with the coupling net's first layer:
    #   Wcat = [[W'^T], [w1^T W'^T[:ch]]],   bcat = [[c], [w1^T c[:ch] + b1]]
    Wcat = jnp.concatenate(
        [Wp, jnp.einsum('khc,kcd->khd', w1T, Wp[:, :ch, :])], axis=1)   # (K, Cs+HD, Cs)
    bcat = jnp.concatenate(
        [c, jnp.einsum('khc,kcl->khl', w1T, c[:, :ch, :]) + b1.reshape(K, HD, 1)],
        axis=1)                                           # (K, Cs+HD, 1)
    w2T = jnp.transpose(w2, (0, 2, 1))                    # (K, Cs, HD)
    b2_c = b2.reshape(K, Cs, 1)
    # constant (sample-independent) part of the log-determinant
    ld_const = jnp.sum(P * jnp.sum(logs, axis=(1, 2)) + P * logdetw[:, 0])

    # --- pad columns so blocks are lane-dense and the grid is >= 2 -----------------
    M_pad = _round_up(M, 256)
    xt_pad = jnp.pad(xt, ((0, 0), (0, M_pad - M))) if M_pad != M else xt
    TM = _pick_col_block(M_pad)
    grid = (M_pad // TM,)
    kernel = functools.partial(_glow_kernel, num_steps=K, ch_half=ch, cs=Cs)

    def full_spec(a):  # small parameter arrays: whole array resident, constant index map
        return pl.BlockSpec(a.shape, lambda i, _n=a.ndim: (0,) * _n)

    z_pad, ldrow = pl.pallas_call(
        kernel,
        out_shape=(jax.ShapeDtypeStruct((Cs, M_pad), jnp.float32),
                   jax.ShapeDtypeStruct((1, M_pad), jnp.float32)),
        grid=grid,
        in_specs=[
            pl.BlockSpec((Cs, TM), lambda i: (0, i)),     # x^T: a big column block
            full_spec(Wcat), full_spec(bcat), full_spec(w2T), full_spec(b2_c),
        ],
        out_specs=(
            pl.BlockSpec((Cs, TM), lambda i: (0, i)),     # z^T
            pl.BlockSpec((1, TM), lambda i: (0, i)),      # per-column sum(log_s)
        ),
        compiler_params=pltpu.CompilerParams(
            dimension_semantics=("parallel",),            # blocks are independent
            vmem_limit_bytes=32 * 1024 * 1024),
    )(xt_pad, Wcat, bcat, w2T, b2_c)

    z_t = z_pad[:, :M]                                    # drop padded columns
    logdet = ldrow[0, :M].reshape(N, P).sum(axis=1) + ld_const
    return z_t, logdet


def glow_prediction_forward(step, x, y, params):
    """x: (B, T, C, H, W) float32 (PyTorch-style NCHW frames). Returns (zcat, zlist, logdet)."""
    del step, y  # unused in the forward math (see TODO notes above)
    B, T, C, H, W = x.shape
    N = B * T
    Hs, Ws = H // 2, W // 2
    Cs = 4 * C
    P = Hs * Ws

    xflat = x.reshape(N, C, H, W)                         # x.reshape(-1, C, H, W)
    # Glow squeeze 2x2 folded directly into the kernel's transposed layout:
    #   (N,C,H,W) -> (Cs, N*P) with channel order c*4 + i*2 + j, column order n*P + h*Ws + w
    xs = xflat.reshape(N, C, Hs, 2, Ws, 2)
    xt = xs.transpose(1, 3, 5, 0, 2, 4).reshape(Cs, N * P)

    z_t, logdet = glow_flow_pallas(xt, params, P)

    z_nchw = z_t.reshape(Cs, N, Hs, Ws).transpose(1, 0, 2, 3)   # (N, Cs, Hs, Ws)
    zcat = z_nchw.reshape(N, -1)
    zlist = [z_nchw]
    return zcat, zlist, logdet


# ----------------------------------------------------------------------------- reference
def glow_flow_ref(xk, params):
    """Pure-JAX reference in the (N, P, Cs) layout."""
    logs, bias, Wm, logdetw, w1, b1, w2, b2 = params
    N, P, Cs = xk.shape
    ch = Cs // 2
    x = xk
    ld = jnp.zeros((N,), jnp.float32)
    for k in range(K):
        x = (x + bias[k]) * jnp.exp(logs[k])
        ld = ld + P * jnp.sum(logs[k])
        x = jnp.einsum('npc,cd->npd', x, Wm[k])
        ld = ld + P * logdetw[k, 0]
        xa, xb = x[..., :ch], x[..., ch:]
        h = jnp.maximum(jnp.einsum('npc,ch->nph', xa, w1[k]) + b1[k], 0.0)
        st = jnp.einsum('nph,hc->npc', h, w2[k]) + b2[k]
        log_s = jnp.tanh(st[..., :ch])
        t = st[..., ch:]
        xb = xb * jnp.exp(log_s) + t
        x = jnp.concatenate([xa, xb], axis=-1)
        ld = ld + jnp.sum(log_s, axis=(1, 2))
    return x, ld


# ----------------------------------------------------------------------------- main
if __name__ == "__main__":
    B, T, C, H, W = 2, 2, 4, 16, 16        # small (B, T, C, H, W) video-frame shapes
    Cs = 4 * C                             # channels after the 2x2 squeeze
    ch = Cs // 2
    N = B * T

    key = jax.random.PRNGKey(0)
    ks = jax.random.split(key, 8)

    x = jax.random.normal(ks[0], (B, T, C, H, W), jnp.float32)
    y = jnp.zeros((N,), jnp.int32)         # unused target, mirrors forward(step, x, y)

    # Deterministic synthetic flow parameters
    logs = 0.05 * jax.random.normal(ks[1], (K, 1, Cs), jnp.float32)
    bias = 0.05 * jax.random.normal(ks[2], (K, 1, Cs), jnp.float32)
    Wm = jnp.stack([jnp.linalg.qr(jax.random.normal(ks[3 + k], (Cs, Cs), jnp.float32))[0]
                    for k in range(K)]).astype(jnp.float32)
    logdetw = jnp.stack([jnp.linalg.slogdet(Wm[k])[1] for k in range(K)]
                        ).reshape(K, 1).astype(jnp.float32)
    w1 = 0.1 * jax.random.normal(ks[5], (K, ch, HD), jnp.float32)
    b1 = jnp.zeros((K, 1, HD), jnp.float32)
    w2 = 0.1 * jax.random.normal(ks[6], (K, HD, Cs), jnp.float32)
    b2 = jnp.zeros((K, 1, Cs), jnp.float32)
    params = (logs, bias, Wm, logdetw, w1, b1, w2, b2)

    zcat, zlist, logdet = jax.block_until_ready(glow_prediction_forward(0, x, y, params))

    # Pure-JAX reference check (original (N, P, Cs) layout)
    xflat = x.reshape(N, C, H, W)
    xs = xflat.reshape(N, C, H // 2, 2, W // 2, 2).transpose(0, 1, 3, 5, 2, 4)
    xs = xs.reshape(N, Cs, H // 2, W // 2)
    xk = xs.transpose(0, 2, 3, 1).reshape(N, (H // 2) * (W // 2), Cs)
    z_ref, ld_ref = glow_flow_ref(xk, params)
    zcat_ref = z_ref.reshape(N, H // 2, W // 2, Cs).transpose(0, 3, 1, 2).reshape(N, -1)

    assert zcat.shape == (N, C * H * W)
    assert zlist[0].shape == (N, Cs, H // 2, W // 2)
    assert logdet.shape == (N,)
    assert np.allclose(np.asarray(zcat), np.asarray(zcat_ref), atol=2e-3, rtol=2e-3)
    assert np.allclose(np.asarray(logdet), np.asarray(ld_ref), atol=2e-3, rtol=2e-3)

    print("KERNEL_OK")
</pallas_src>

<mosaic_0001>
module attributes {stable_mosaic.version = 11 : i64} {
  func.func @_glow_kernel(%arg0: i32, %arg1: memref<16x128xf32, #tpu.memory_space<vmem>>, %arg2: memref<2x48x16xf32, #tpu.memory_space<vmem>>, %arg3: memref<2x48x1xf32, #tpu.memory_space<vmem>>, %arg4: memref<2x16x32xf32, #tpu.memory_space<vmem>>, %arg5: memref<2x16x1xf32, #tpu.memory_space<vmem>>, %arg6: memref<16x128xf32, #tpu.memory_space<vmem>>, %arg7: memref<1x128xf32, #tpu.memory_space<vmem>>) attributes {dimension_semantics = [#tpu.dimension_semantics<parallel>], iteration_bounds = array<i64: 2>, scalar_prefetch = 0 : i64, scratch_operands = 0 : i64, tpu.core_type = #tpu.core_type<tc>, window_params = [{transform_indices = @transform_0, window_bounds = array<i64: 16, 128>}, {pipeline_mode = #tpu.pipeline_mode<synchronous>, transform_indices = @transform_1, window_bounds = array<i64: 2, 48, 16>}, {pipeline_mode = #tpu.pipeline_mode<synchronous>, transform_indices = @transform_2, window_bounds = array<i64: 2, 48, 1>}, {pipeline_mode = #tpu.pipeline_mode<synchronous>, transform_indices = @transform_3, window_bounds = array<i64: 2, 16, 32>}, {pipeline_mode = #tpu.pipeline_mode<synchronous>, transform_indices = @transform_4, window_bounds = array<i64: 2, 16, 1>}, {transform_indices = @transform_5, window_bounds = array<i64: 16, 128>}, {transform_indices = @transform_6, window_bounds = array<i64: 1, 128>}]} {
    %c0 = arith.constant 0 : index
    %c0_0 = arith.constant 0 : index
    %0 = vector.load %arg1[%c0, %c0_0] : memref<16x128xf32, #tpu.memory_space<vmem>>, vector<16x128xf32>
    %cst = arith.constant 0.000000e+00 : f32
    %1 = vector.broadcast %cst : f32 to vector<1x128xf32>
    %c0_1 = arith.constant 0 : index
    %c0_2 = arith.constant 0 : index
    %c0_3 = arith.constant 0 : index
    %2 = vector.load %arg2[%c0_1, %c0_2, %c0_3] : memref<2x48x16xf32, #tpu.memory_space<vmem>>, vector<1x48x16xf32>
    %3 = vector.shape_cast %2 : vector<1x48x16xf32> to vector<48x16xf32>
    %cst_4 = arith.constant dense<0.000000e+00> : vector<48x128xf32>
    %4 = tpu.matmul %3, %0, %cst_4 {dimension_numbers = #tpu.dot_dimension_numbers<[1], [0], [0], [1], [0, 0, 1, 1], [], []>} : vector<48x16xf32>, vector<16x128xf32>, vector<48x128xf32> -> vector<48x128xf32>
    %c0_5 = arith.constant 0 : index
    %c0_6 = arith.constant 0 : index
    %c0_7 = arith.constant 0 : index
    %5 = vector.load %arg3[%c0_5, %c0_6, %c0_7] : memref<2x48x1xf32, #tpu.memory_space<vmem>>, vector<1x48x1xf32>
    %6 = vector.shape_cast %5 : vector<1x48x1xf32> to vector<48x1xf32>
    %7 = vector.broadcast %6 : vector<48x1xf32> to vector<48x128xf32>
    %8 = arith.addf %4, %7 : vector<48x128xf32>
    %9 = vector.extract_strided_slice %8 {offsets = [0, 0], sizes = [8, 128], strides = [1, 1]} : vector<48x128xf32> to vector<8x128xf32>
    %10 = vector.extract_strided_slice %8 {offsets = [8, 0], sizes = [8, 128], strides = [1, 1]} : vector<48x128xf32> to vector<8x128xf32>
    %11 = vector.extract_strided_slice %8 {offsets = [16, 0], sizes = [32, 128], strides = [1, 1]} : vector<48x128xf32> to vector<32x128xf32>
    %cst_8 = arith.constant 0.000000e+00 : f32
    %12 = vector.broadcast %cst_8 : f32 to vector<32x128xf32>
    %13 = arith.maximumf %11, %12 : vector<32x128xf32>
    %c0_9 = arith.constant 0 : index
    %c0_10 = arith.constant 0 : index
    %c0_11 = arith.constant 0 : index
    %14 = vector.load %arg4[%c0_9, %c0_10, %c0_11] : memref<2x16x32xf32, #tpu.memory_space<vmem>>, vector<1x16x32xf32>
    %15 = vector.shape_cast %14 : vector<1x16x32xf32> to vector<16x32xf32>
    %cst_12 = arith.constant dense<0.000000e+00> : vector<16x128xf32>
    %16 = tpu.matmul %15, %13, %cst_12 {dimension_numbers = #tpu.dot_dimension_numbers<[1], [0], [0], [1], [0, 0, 1, 1], [], []>} : vector<16x32xf32>, vector<32x128xf32>, vector<16x128xf32> -> vector<16x128xf32>
    %c0_13 = arith.constant 0 : index
    %c0_14 = arith.constant 0 : index
    %c0_15 = arith.constant 0 : index
    %17 = vector.load %arg5[%c0_13, %c0_14, %c0_15] : memref<2x16x1xf32, #tpu.memory_space<vmem>>, vector<1x16x1xf32>
    %18 = vector.shape_cast %17 : vector<1x16x1xf32> to vector<16x1xf32>
    %19 = vector.broadcast %18 : vector<16x1xf32> to vector<16x128xf32>
    %20 = arith.addf %16, %19 : vector<16x128xf32>
    %21 = vector.extract_strided_slice %20 {offsets = [0, 0], sizes = [8, 128], strides = [1, 1]} : vector<16x128xf32> to vector<8x128xf32>
    %22 = math.tanh %21 : vector<8x128xf32>
    %23 = vector.extract_strided_slice %20 {offsets = [8, 0], sizes = [8, 128], strides = [1, 1]} : vector<16x128xf32> to vector<8x128xf32>
    %24 = math.exp %22 : vector<8x128xf32>
    %25 = arith.mulf %10, %24 : vector<8x128xf32>
    %26 = arith.addf %25, %23 : vector<8x128xf32>
    %cst_16 = arith.constant dense<0.000000e+00> : vector<128xf32>
    %27 = vector.multi_reduction <add>, %22, %cst_16 [0] : vector<8x128xf32> to vector<128xf32>
    %28 = vector.shape_cast %27 : vector<128xf32> to vector<1x128xf32>
    %29 = arith.addf %1, %28 : vector<1x128xf32>
    %30 = tpu.concatenate %9, %26 in 0 : vector<8x128xf32>, vector<8x128xf32> -> vector<16x128xf32>
    %c1 = arith.constant 1 : index
    %c0_17 = arith.constant 0 : index
    %c0_18 = arith.constant 0 : index
    %31 = vector.load %arg2[%c1, %c0_17, %c0_18] : memref<2x48x16xf32, #tpu.memory_space<vmem>>, vector<1x48x16xf32>
    %32 = vector.shape_cast %31 : vector<1x48x16xf32> to vector<48x16xf32>
    %cst_19 = arith.constant dense<0.000000e+00> : vector<48x128xf32>
    %33 = tpu.matmul %32, %30, %cst_19 {dimension_numbers = #tpu.dot_dimension_numbers<[1], [0], [0], [1], [0, 0, 1, 1], [], []>} : vector<48x16xf32>, vector<16x128xf32>, vector<48x128xf32> -> vector<48x128xf32>
    %c1_20 = arith.constant 1 : index
    %c0_21 = arith.constant 0 : index
    %c0_22 = arith.constant 0 : index
    %34 = vector.load %arg3[%c1_20, %c0_21, %c0_22] : memref<2x48x1xf32, #tpu.memory_space<vmem>>, vector<1x48x1xf32>
    %35 = vector.shape_cast %34 : vector<1x48x1xf32> to vector<48x1xf32>
    %36 = vector.broadcast %35 : vector<48x1xf32> to vector<48x128xf32>
    %37 = arith.addf %33, %36 : vector<48x128xf32>
    %38 = vector.extract_strided_slice %37 {offsets = [0, 0], sizes = [8, 128], strides = [1, 1]} : vector<48x128xf32> to vector<8x128xf32>
    %39 = vector.extract_strided_slice %37 {offsets = [8, 0], sizes = [8, 128], strides = [1, 1]} : vector<48x128xf32> to vector<8x128xf32>
    %40 = vector.extract_strided_slice %37 {offsets = [16, 0], sizes = [32, 128], strides = [1, 1]} : vector<48x128xf32> to vector<32x128xf32>
    %cst_23 = arith.constant 0.000000e+00 : f32
    %41 = vector.broadcast %cst_23 : f32 to vector<32x128xf32>
    %42 = arith.maximumf %40, %41 : vector<32x128xf32>
    %c1_24 = arith.constant 1 : index
    %c0_25 = arith.constant 0 : index
    %c0_26 = arith.constant 0 : index
    %43 = vector.load %arg4[%c1_24, %c0_25, %c0_26] : memref<2x16x32xf32, #tpu.memory_space<vmem>>, vector<1x16x32xf32>
    %44 = vector.shape_cast %43 : vector<1x16x32xf32> to vector<16x32xf32>
    %cst_27 = arith.constant dense<0.000000e+00> : vector<16x128xf32>
    %45 = tpu.matmul %44, %42, %cst_27 {dimension_numbers = #tpu.dot_dimension_numbers<[1], [0], [0], [1], [0, 0, 1, 1], [], []>} : vector<16x32xf32>, vector<32x128xf32>, vector<16x128xf32> -> vector<16x128xf32>
    %c1_28 = arith.constant 1 : index
    %c0_29 = arith.constant 0 : index
    %c0_30 = arith.constant 0 : index
    %46 = vector.load %arg5[%c1_28, %c0_29, %c0_30] : memref<2x16x1xf32, #tpu.memory_space<vmem>>, vector<1x16x1xf32>
    %47 = vector.shape_cast %46 : vector<1x16x1xf32> to vector<16x1xf32>
    %48 = vector.broadcast %47 : vector<16x1xf32> to vector<16x128xf32>
    %49 = arith.addf %45, %48 : vector<16x128xf32>
    %50 = vector.extract_strided_slice %49 {offsets = [0, 0], sizes = [8, 128], strides = [1, 1]} : vector<16x128xf32> to vector<8x128xf32>
    %51 = math.tanh %50 : vector<8x128xf32>
    %52 = vector.extract_strided_slice %49 {offsets = [8, 0], sizes = [8, 128], strides = [1, 1]} : vector<16x128xf32> to vector<8x128xf32>
    %53 = math.exp %51 : vector<8x128xf32>
    %54 = arith.mulf %39, %53 : vector<8x128xf32>
    %55 = arith.addf %54, %52 : vector<8x128xf32>
    %cst_31 = arith.constant dense<0.000000e+00> : vector<128xf32>
    %56 = vector.multi_reduction <add>, %51, %cst_31 [0] : vector<8x128xf32> to vector<128xf32>
    %57 = vector.shape_cast %56 : vector<128xf32> to vector<1x128xf32>
    %58 = arith.addf %29, %57 : vector<1x128xf32>
    %c0_32 = arith.constant 0 : index
    %c0_33 = arith.constant 0 : index
    %59 = vector.load %arg6[%c0_32, %c0_33] : memref<16x128xf32, #tpu.memory_space<vmem>>, vector<8x128xf32>
    tpu.vector_store %arg6[%c0_32, %c0_33], %38 {strides = array<i32>} : memref<16x128xf32, #tpu.memory_space<vmem>>, vector<8x128xf32>,
    %c8 = arith.constant 8 : index
    %c0_34 = arith.constant 0 : index
    %60 = vector.load %arg6[%c8, %c0_34] : memref<16x128xf32, #tpu.memory_space<vmem>>, vector<8x128xf32>
    tpu.vector_store %arg6[%c8, %c0_34], %55 {strides = array<i32>} : memref<16x128xf32, #tpu.memory_space<vmem>>, vector<8x128xf32>,
    %c0_35 = arith.constant 0 : index
    %c0_36 = arith.constant 0 : index
    %61 = vector.load %arg7[%c0_35, %c0_36] : memref<1x128xf32, #tpu.memory_space<vmem>>, vector<1x128xf32>
    tpu.vector_store %arg7[%c0_35, %c0_36], %58 {strides = array<i32>} : memref<1x128xf32, #tpu.memory_space<vmem>>, vector<1x128xf32>,
    return
  }
  func.func @transform_0(%arg0: i32) -> (i32, i32) {
    %c0_i32 = arith.constant 0 : i32
    %c0_i32_0 = arith.constant 0 : i32
    return %c0_i32, %arg0 : i32, i32
  }
  func.func @transform_1(%arg0: i32) -> (i32, i32, i32) {
    %c0_i32 = arith.constant 0 : i32
    %c0_i32_0 = arith.constant 0 : i32
    %c0_i32_1 = arith.constant 0 : i32
    %c0_i32_2 = arith.constant 0 : i32
    return %c0_i32, %c0_i32_0, %c0_i32_1 : i32, i32, i32
  }
  func.func @transform_2(%arg0: i32) -> (i32, i32, i32) {
    %c0_i32 = arith.constant 0 : i32
    %c0_i32_0 = arith.constant 0 : i32
    %c0_i32_1 = arith.constant 0 : i32
    %c0_i32_2 = arith.constant 0 : i32
    return %c0_i32, %c0_i32_0, %c0_i32_1 : i32, i32, i32
  }
  func.func @transform_3(%arg0: i32) -> (i32, i32, i32) {
    %c0_i32 = arith.constant 0 : i32
    %c0_i32_0 = arith.constant 0 : i32
    %c0_i32_1 = arith.constant 0 : i32
    %c0_i32_2 = arith.constant 0 : i32
    return %c0_i32, %c0_i32_0, %c0_i32_1 : i32, i32, i32
  }
  func.func @transform_4(%arg0: i32) -> (i32, i32, i32) {
    %c0_i32 = arith.constant 0 : i32
    %c0_i32_0 = arith.constant 0 : i32
    %c0_i32_1 = arith.constant 0 : i32
    %c0_i32_2 = arith.constant 0 : i32
    return %c0_i32, %c0_i32_0, %c0_i32_1 : i32, i32, i32
  }
  func.func @transform_5(%arg0: i32) -> (i32, i32) {
    %c0_i32 = arith.constant 0 : i32
    %c0_i32_0 = arith.constant 0 : i32
    return %c0_i32, %arg0 : i32, i32
  }
  func.func @transform_6(%arg0: i32) -> (i32, i32) {
    %c0_i32 = arith.constant 0 : i32
    %c0_i32_0 = arith.constant 0 : i32
    return %c0_i32, %arg0 : i32, i32
  }
}

</mosaic_0001>

<bundles_post_ra>
// kernel: tpu_custom_call.1
= control target key start
LH: loop header
LB: loop body
LE: loop exit
PB: predicated region body
PF: predicated region fallthrough
CT: control target
= control target key end

     0   :  { %12 = vsyncpa [#allocation4], 0  ;;  %s1575_s0 = inlined_call_operand.vmem [shape: f32[16,256], index: 0, kind: input, shape index: {}]   ;;  %s1576_s1 = inlined_call_operand.vmem [shape: f32[2,48,16], index: 1, kind: input, shape index: {}]   ;;  %s1577_s2 = inlined_call_operand.vmem [shape: f32[2,48,1], index: 2, kind: input, shape index: {}]   ;;  %s1578_s3 = inlined_call_operand.vmem [shape: f32[2,16,32], index: 3, kind: input, shape index: {}]   ;;  %s1579_s4 = inlined_call_operand.vmem [shape: f32[2,16,1], index: 4, kind: input, shape index: {}]   ;;  %s1580_s5 = inlined_call_operand.hbm [shape: f32[16,256], index: 5, kind: output, shape index: {0}]   ;;  %s1581_s6 = inlined_call_operand.hbm [shape: f32[1,256], index: 6, kind: output, shape index: {1}]  }
   0x1   :  { %14 = vsyncpa [#allocation4 + $0x1], 0 }
   0x2   :  { %15 = vsyncpa [#allocation6], 0 }
   0x3   :  { %17 = vsyncpa [#allocation6 + $0x1], 0  ;;  %s1307_s21 = smov 0   ;;  %s1309_s22 = smov 0  }
   0x4   :  { %s1311_s23 = smov 0   ;;  %s1313_s24 = smov 0  }
   0x5 LB: > { %s1328_s25 = sadd.s32 4294967295, %s1264_s24   ;;  %s967_s26 = sadd.s32 4294967294, %s1264_s24   ;;  %s1264_s24 = sphi %s1313_s24, %s1587_s24   ;;  %s1260_s23 = sphi %s1311_s23, %s1586_s23   ;;  %s1256_s22 = sphi %s1309_s22, %s1585_s22   ;;  %s1252_s21 = sphi %s1307_s21, %s1584_s21  }
   0x6   : > { %s1332_s27 = sadd.s32 1, %s1264_s24   ;;  %s30_s28 = sadd.s32 1, %s1260_s23 }
   0x7   : > { %s27_s29 = ssub.s32 %s1264_s24, %s1332_s27  ;;  %p37_p0 = scmp.ne.s32.totalorder %s1260_s23, %s1256_s22 }
   0x8   : > { %p28_p1 = scmp.eq.s32.totalorder %s27_s29, 0  ;;  %p38_p2 = scmp.eq.s32.totalorder %s1264_s24, 0 }
   0x9   : > { %p151_p3 = scmp.eq.s32.totalorder %s1328_s25, 1  ;;  %p156_p4 = scmp.ne.s32.totalorder %s1256_s22, %s1252_s21 }
   0xa   : > { %s1344_s30 = scalar_select %p28_p1, %s1260_s23, %s30_s28  }
   0xb   : > { %p39_p5 = por %p38_p2, %p37_p0  ;;  %p1346_p6 = por %p151_p3, %p37_p0 }
   0xc   : > { %p157_p7 = scmp.eq.s32.totalorder %s967_s26, 1  ;;  %p969_p9 = scmp.ge.s32.totalorder %s1264_s24, 2 }
   0xe   : > { %p1350_p8 = por %p157_p7, %p156_p4  ;;  %211 = sbr.rel (%p969_p9) target bundleno = 28 (0x1c), region = 32 }
  0x15   : > { %214 = sbr.rel (!%p39_p5) target bundleno = 28 (0x1c), region = 36  ;;  %s216_s9 = sand.u32 (%p39_p5), 1, %s1260_s23  }
  0x16   : > { %s971_s10 = sshll.u32 (%p39_p5), %s1264_s24, 3  ;;  %s970_s11 = sshll.u32 (%p39_p5), %s216_s9, 4 }
  0x17   : > { %s220_s14 = scalar_lea.vmem (%p39_p5), %s1575_s0, %s971_s10  ;;  %s218_s15 = scalar_lea.vmem (%p39_p5), [#allocation2], %s970_s11 }
  0x18   : > { %v250_v0 = vld [vmem:[%s220_s14] sm:$0xff] (%p39_p5)  ;;  %v252_v1 = vld [vmem:[%s220_s14 + $0x10] sm:$0xff] (%p39_p5) }
  0x19   : > { %251 = vst [vmem:[%s218_s15] sm:$0xff] (%p39_p5), %v250_v0  ;;  %253 = vst [vmem:[%s218_s15 + $0x8] sm:$0xff] (%p39_p5), %v252_v1 }
  0x1c PF: > { %p972_p10 = scmp.ge.s32.totalorder %s1264_s24, 1  ;;  %p258_p11 = scmp.lt.s32.totalorder %s1264_s24, 3 }
  0x1e   : > { %p259_p12 = pnand %p972_p10, %p258_p11 }
  0x1f   : > { %s1365_s16 = sand.u32 (!%p259_p12), 1, %s1256_s22   ;;  %v300_v2 = vld [vmem:[%s1576_s1] sm:$0xff] (!%p259_p12)  ;;  %vm342_vm0 = vcmask (!%p259_p12), 130048   ;;  %v1266_v3 = vmov (!%p259_p12), 0   ;;  %v308_v4 = vld [vmem:[%s1577_s2 + $0x10] sm:$0xff] (!%p259_p12)  ;;  %v309_v9 = vld [vmem:[%s1577_s2 + $0x18] sm:$0xff] (!%p259_p12) }
  0x20   : > { %262 = sbr.rel (%p259_p12) target bundleno = 1032 (0x408), region = 74  ;;  %s973_s19 = sshll.u32 (!%p259_p12), %s1365_s16, 4  ;;  %1044 = vmatprep.mubr.msk.f32.mxu0 (!%p259_p12), %vm342_vm0, %v300_v2  ;;  %1160 = vset.pattern.permute.xlu0 (!%p259_p12), %v1266_v3  ;;  %v310_v5 = vld [vmem:[%s1577_s2 + $0x20] sm:$0xff] (!%p259_p12)  ;;  %v311_v10 = vld [vmem:[%s1577_s2 + $0x28] sm:$0xff] (!%p259_p12)  ;;  %v302_v12 = vld [vmem:[%s1576_s1 + $0x10] sm:$0xff] (!%p259_p12)  ;;  %vm474_vm1 = vcmask (!%p259_p12), 261120  }
  0x21   : > { %1161 = vset.pattern.permute.xlu1 (!%p259_p12), %v1266_v3  ;;  %s267_s9 = scalar_lea.vmem (!%p259_p12), [#allocation2], %s973_s19  ;;  %324 = vperm.xlu0 (!%p259_p12), %1160, %v308_v4   ;;  %v301_v11 = vld [vmem:[%s1576_s1 + $0x8] sm:$0xff] (!%p259_p12)  ;;  %v462_v13 = vld [vmem:[%s1579_s4] sm:$0xff] (!%p259_p12)  ;;  %v303_v15 = vld [vmem:[%s1576_s1 + $0x18] sm:$0xff] (!%p259_p12)  ;;  %s1483_s14 = scalar_lea.vmem (!%p259_p12), [#allocation3], %s973_s19 }
  0x22   : > { %v298_v6 = vld [vmem:[%s267_s9] sm:$0xff] (!%p259_p12)  ;;  %v299_v7 = vld [vmem:[%s267_s9 + $0x8] sm:$0xff] (!%p259_p12)  ;;  %334 = vperm.xlu1 (!%p259_p12), %1161, %v310_v5   ;;  %s858_s17 = sshll.u32 (!%p259_p12), %s1483_s14, 4  ;;  %s1009_s18 = sshll.u32 (!%p259_p12), %s1328_s25, 4  ;;  %s1496_s17 = int_to_ptr.vmem [resolvable:$true] %s858_s17 }
  0x23   : > { %v1088_v8 = vpack.c.bf16 (!%p259_p12), %v299_v7, %v298_v6  ;;  %v307_v14 = vld [vmem:[%s1577_s2 + $0x8] sm:$0xff] (!%p259_p12)  ;;  %v304_v16 = vld [vmem:[%s1576_s1 + $0x20] sm:$0xff] (!%p259_p12)  ;;  %v993_v22 = vld [vmem:[%s1577_s2 + $0x50] sm:$0xff] (!%p259_p12)  ;;  %s297_s20 = scalar_lea.vmem (!%p259_p12), [#allocation5], %s1365_s16  ;;  %s1008_s28 = sshll.u32 (!%p259_p12), %s1328_s25, 7 }
  0x24   : > { %v463_v17 = vld [vmem:[%s1579_s4 + $0x8] sm:$0xff] (!%p259_p12)  ;;  %v306_v18 = vld [vmem:[%s1577_s2] sm:$0xff] (!%p259_p12)  ;;  %v994_v23 = vld [vmem:[%s1577_s2 + $0x58] sm:$0xff] (!%p259_p12)  ;;  %s874_s26 = sshll.u32 (!%p259_p12), %s297_s20, 4  ;;  %s1501_s10 = scalar_lea.hbm (!%p259_p12), %s1581_s6, %s1009_s18  ;;  %s1503_s26 = int_to_ptr.vmem [resolvable:$true] %s874_s26 }
  0x25   : > { %1089 = vmatprep.subr.bf16.mxu0 (!%p259_p12), %v1088_v8  ;;  %329 = vperm.xlu0 (!%p259_p12), %1160, %v309_v9   ;;  %v305_v19 = vld [vmem:[%s1576_s1 + $0x28] sm:$0xff] (!%p259_p12)  ;;  %v991_v20 = vld [vmem:[%s1577_s2 + $0x40] sm:$0xff] (!%p259_p12)  ;;  %v1003_v24 = vld [vmem:[%s1579_s4 + $0x10] sm:$0xff] (!%p259_p12)  ;;  %s1508_s12 = scalar_lea.hbm (!%p259_p12), %s1580_s5, %s1008_s28  ;;  %s847_s13 = scalar_lea.sflag (!%p259_p12), [#allocation6], %s1365_s16 }
  0x26   : > { %1091 = vmatpush3.bf16.msra.mxu0 (!%p259_p12), %v1088_v8  ;;  %339 = vperm.xlu1 (!%p259_p12), %1161, %v311_v10   ;;  %v992_v21 = vld [vmem:[%s1577_s2 + $0x48] sm:$0xff] (!%p259_p12)  ;;  %v990_v25 = vld [vmem:[%s1577_s2 + $0x38] sm:$0xff] (!%p259_p12)  ;;  %v989_v27 = vld [vmem:[%s1577_s2 + $0x30] sm:$0xff] (!%p259_p12)  ;;  %s1170_s19 = scalar_lea.vmem (!%p259_p12), %s1503_s26, 16  ;;  %s1267_s15 = smov (!%p259_p12), [#allocation5]  }
  0x27   : > { %v1004_v26 = vld [vmem:[%s1579_s4 + $0x18] sm:$0xff]  ;;  %v460_v28 = vld [vmem:[%s1578_s3] sm:$0xff]  ;;  %v461_v49 = vld [vmem:[%s1578_s3 + $0x8] sm:$0xff]  ;;  %p1171_p13 = scmp.ne.s32.totalorder %s1503_s26, %s1170_s19  ;;  %s1174_s18 = sshll.u32 %s1267_s15, 4  ;;  %s1175_s18 = int_to_ptr.vmem [resolvable:$false] %s1174_s18 }
  0x28   : > { %1061 = vmatprep.mubr.msk.f32.mxu1 %vm474_vm1, %v460_v28  ;;  %v983_v50 = vld [vmem:[%s1576_s1 + $0x30] sm:$0xff]  ;;  %v984_v3 = vld [vmem:[%s1576_s1 + $0x38] sm:$0xff]  ;;  %v985_v4 = vld [vmem:[%s1576_s1 + $0x40] sm:$0xff]  ;;  %s1176_s29 = scalar_lea.vmem %s1175_s18, 32  ;;  %p1177_p2 = scmp.lt.s32.totalorder %s1503_s26, %s1175_s18 }
  0x29   : > { %1045 = vmatmul.mubr.msk.f32.vlgmr.msra.gmra.mrb[0].mxu0 %vm342_vm0, %v301_v11  ;;  %466 = vperm.xlu0 %1160, %v462_v13   ;;  %v986_v5 = vld [vmem:[%s1576_s1 + $0x48] sm:$0xff]  ;;  %v987_v6 = vld [vmem:[%s1576_s1 + $0x50] sm:$0xff]  ;;  %v988_v7 = vld [vmem:[%s1576_s1 + $0x58] sm:$0xff]  ;;  %p1172_p0 = pnand %p1171_p13, %p1346_p6  ;;  %p1178_p3 = scmp.lt.s32.totalorder %s1176_s29, %s1170_s19 }
  0x2a   : > { %1047 = vmatprep.mubr.msk.f32.mxu0 %vm342_vm0, %v302_v12  ;;  %319 = vperm.xlu1 %1161, %v307_v14   ;;  %v1001_v8 = vld [vmem:[%s1578_s3 + $0x10] sm:$0xff] }
  0x2b   : > { %p1173_p1 = pneg %p1172_p0  ;;  %p1179_p4 = por %p1178_p3, %p1177_p2 }
  0x2d   : > { %1048 = vmatmul.mubr.msk.f32.gmra.mrb[2].mxu0 %vm342_vm0, %v303_v15  ;;  %471 = vperm.xlu0 %1160, %v463_v17   ;;  %p1180_p5 = pnand %p1179_p4, %p1173_p1 }
  0x2e   : > { %1050 = vmatprep.mubr.msk.f32.mxu0 %vm342_vm0, %v304_v16  ;;  %314 = vperm.xlu1 %1161, %v306_v18  }
  0x31   : > { %1051 = vmatmul.mubr.msk.f32.gmra.mrb[4].mxu0 %vm342_vm0, %v305_v19  ;;  %594 = vperm.xlu0 %1160, %v991_v20  }
  0x32   : > { %599 = vperm.xlu1 %1161, %v992_v21   ;;  %1085 = vmatprep.mubr.msk.f32.mxu0 %vm474_vm1, %v1001_v8 }
  0x35   : > { %604 = vperm.xlu0 %1160, %v993_v22  }
  0x36   : > { %609 = vperm.xlu1 %1161, %v994_v23  }
  0x39   : > { %737 = vperm.xlu0 %1160, %v1003_v24  }
  0x3a   : > { %589 = vperm.xlu1 %1161, %v990_v25  }
  0x3d   : > { %742 = vperm.xlu0 %1160, %v1004_v26  }
  0x3e   : > { %584 = vperm.xlu1 %1161, %v989_v27  }
  0xa0   : > { %v325_v29 = vpop.permute.xlu0 %324 }
  0xa1   : > { %v335_v32 = vpop.permute.xlu1 %334 }
  0xa4   : > { %v330_v33 = vpop.permute.xlu0 %329 }
  0xa5   : > { %v340_v39 = vpop.permute.xlu1 %339 }
  0xa8   : > { %v467_v52 = vpop.permute.xlu0 %466 }
  0xa9   : > { %v320_v57 = vpop.permute.xlu1 %319 }
  0xac   : > { %v472_v60 = vpop.permute.xlu0 %471 }
  0xad   : > { %v315_v63 = vpop.permute.xlu1 %314 }
  0xb0   : > { %v595_v16 = vpop.permute.xlu0 %594 }
  0xb1   : > { %v600_v9 = vpop.permute.xlu1 %599 }
  0xb4   : > { %v605_v24 = vpop.permute.xlu0 %604 }
  0xb5   : > { %v610_v10 = vpop.permute.xlu1 %609 }
  0xb9   : > { %v590_v11 = vpop.permute.xlu1 %589 }
  0xbd   : > { %v585_v13 = vpop.permute.xlu1 %584 }
  0xfc   : > { %v1046_v30 = vpop.f32.mrb[0].mxu0 }
  0xfd   : > { %v427_v31 = vpop.f32.mrb[1].mxu0  ;;  %v433_v58 = vadd.f32 %v1046_v30, %v320_v57 }
  0xfe   : > { %v428_v0 = vadd.f32 %v427_v31, %v315_v63 }
 0x100   : > { %v1049_v34 = vpop.f32.mrb[2].mxu0 }
 0x101   : > { %v443_v35 = vadd.f32 %v1049_v34, %v330_v33  ;;  %v437_v36 = vpop.f32.mrb[3].mxu0  ;;  %v738_v34 = vpop.permute.xlu0 %737 }
 0x102   : > { %v438_v37 = vadd.f32 %v437_v36, %v325_v29 }
 0x103   : > { %v457_v38 = vmax.f32 %v443_v35, 0.0 }
 0x104   : > { %v456_v40 = vmax.f32 %v438_v37, 0.0  ;;  %v1052_v41 = vpop.f32.mrb[4].mxu0 }
 0x105   : > { %v453_v42 = vadd.f32 %v1052_v41, %v340_v39  ;;  %v447_v43 = vpop.f32.mrb[5].mxu0 }
 0x106   : > { %v448_v44 = vadd.f32 %v447_v43, %v335_v32  ;;  %v1092_v45 = vpack.c.bf16 %v457_v38, %v456_v40  ;;  %v1002_v32 = vld [vmem:[%s1578_s3 + $0x18] sm:$0xff] }
 0x107   : > { %v459_v46 = vmax.f32 %v453_v42, 0.0 }
 0x108   : > { %v458_v47 = vmax.f32 %v448_v44, 0.0  ;;  %1093 = vmatprep.subr.bf16.mxu1 %v1092_v45 }
 0x109   : > { %1095 = vmatpush3.bf16.msra.mxu1 %v1092_v45 }
 0x10a   : > { %v1096_v48 = vpack.c.bf16 %v459_v46, %v458_v47 }
 0x10c   : > { %1097 = vmatprep.subr.bf16.mxu1 %v1096_v48 }
 0x10d   : > { %1099 = vmatpush3.bf16.msra.mxu1 %v1096_v48 }
 0x110   : > { %1062 = vmatmul.mubr.msk.f32.vlgmr.msra.gmra.mrb[0].mxu1 %vm474_vm1, %v461_v49 }
 0x111   : > { %1068 = vmatprep.mubr.msk.f32.mxu1 %vm342_vm0, %v983_v50 }
 0x1e3   : > { %v1063_v51 = vpop.f32.mrb[0].mxu1 }
 0x1e4   : > { %v547_v53 = vpop.f32.mrb[1].mxu1  ;;  %v553_v61 = vadd.f32 %v1063_v51, %v472_v60 }
 0x1e5   : > { %v548_v54 = vadd.f32 %v547_v53, %v467_v52  ;;  %v743_v53 = vpop.permute.xlu0 %742 }
 0x1e7   : > { %1162 = vtanh.f32 %v548_v54 }
 0x1f1   : > { %v1454_v55 = vpop.eup %1162 }
 0x1f2   : > { %v557_v56 = vmul.f32 1.442695, %v1454_v55  ;;  %v561_v37 = vrot.slane %v1454_v55, 4 }
 0x1f4   : > { %1164 = vpow2.f32 %v557_v56  ;;  %v562_v38 = vadd.f32 %v1454_v55, %v561_v37 }
 0x1f6   : > { %v563_v39 = vrot.slane %v562_v38, 2 }
 0x1f8   : > { %v564_v43 = vadd.f32 %v563_v39, %v562_v38 }
 0x1fa   : > { %v565_v46 = vrot.slane %v564_v43, 1 }
 0x1fc   : > { %v566_v49 = vadd.f32 %v565_v46, %v564_v43 }
 0x1fe   : > { %v1165_v59 = vpop.eup %1164 }
 0x1ff   : > { %v559_v62 = vmul.f32 %v1165_v59, %v433_v58 }
 0x201   : > { %v560_v1 = vadd.f32 %v559_v62, %v553_v61 }
 0x203   : > { %v1100_v2 = vpack.c.bf16 %v560_v1, %v428_v0 }
 0x205   : > { %1101 = vmatprep.subr.bf16.mxu1 %v1100_v2 }
 0x206   : > { %1103 = vmatpush3.bf16.msra.mxu1 %v1100_v2 }
 0x209   : > { %1069 = vmatmul.mubr.msk.f32.vlgmr.msra.gmra.mrb[2].mxu1 %vm342_vm0, %v984_v3 }
 0x20a   : > { %1071 = vmatprep.mubr.msk.f32.mxu1 %vm342_vm0, %v985_v4 }
 0x20d   : > { %1072 = vmatmul.mubr.msk.f32.gmra.mrb[4].mxu1 %vm342_vm0, %v986_v5 }
 0x20e   : > { %1074 = vmatprep.mubr.msk.f32.mxu1 %vm342_vm0, %v987_v6 }
 0x211   : > { %1075 = vmatmul.mubr.msk.f32.gmra.mrb[6].mxu1 %vm342_vm0, %v988_v7 }
 0x2dc   : > { %v1070_v12 = vpop.f32.mrb[2].mxu1 }
 0x2dd   : > { %v696_v14 = vpop.f32.mrb[3].mxu1  ;;  %v702_v51 = vadd.f32 %v1070_v12, %v590_v11 }
 0x2de   : > { %v697_v15 = vadd.f32 %v696_v14, %v585_v13 }
 0x2e0   : > { %838 = vst [vmem:[%s1483_s14] sm:$0xff] %v697_v15  ;;  %v1073_v17 = vpop.f32.mrb[4].mxu1 }
 0x2e1   : > { %v712_v18 = vadd.f32 %v1073_v17, %v600_v9  ;;  %v706_v19 = vpop.f32.mrb[5].mxu1 }
 0x2e2   : > { %v707_v20 = vadd.f32 %v706_v19, %v595_v16 }
 0x2e3   : > { %v726_v21 = vmax.f32 %v712_v18, 0.0 }
 0x2e4   : > { %v725_v22 = vmax.f32 %v707_v20, 0.0  ;;  %v1076_v23 = vpop.f32.mrb[6].mxu1 }
 0x2e5   : > { %v722_v25 = vadd.f32 %v1076_v23, %v610_v10  ;;  %v716_v26 = vpop.f32.mrb[7].mxu1 }
 0x2e6   : > { %v1104_v27 = vpack.c.bf16 %v726_v21, %v725_v22  ;;  %v717_v28 = vadd.f32 %v716_v26, %v605_v24 }
 0x2e7   : > { %v728_v29 = vmax.f32 %v722_v25, 0.0 }
 0x2e8   : > { %v727_v30 = vmax.f32 %v717_v28, 0.0  ;;  %1105 = vmatprep.subr.bf16.mxu0 %v1104_v27 }
 0x2e9   : > { %1107 = vmatpush3.bf16.msra.mxu0 %v1104_v27 }
 0x2ea   : > { %v1108_v31 = vpack.c.bf16 %v728_v29, %v727_v30 }
 0x2ec   : > { %1109 = vmatprep.subr.bf16.mxu0 %v1108_v31 }
 0x2ed   : > { %1111 = vmatpush3.bf16.msra.mxu0 %v1108_v31 }
 0x2f0   : > { %1086 = vmatmul.mubr.msk.f32.vlgmr.msra.gmra.mrb[6].mxu0 %vm474_vm1, %v1002_v32 }
 0x3c3   : > { %v1087_v33 = vpop.f32.mrb[6].mxu0 }
 0x3c4   : > { %v817_v35 = vpop.f32.mrb[7].mxu0  ;;  %v823_v55 = vadd.f32 %v1087_v33, %v743_v53 }
 0x3c5   : > { %v818_v36 = vadd.f32 %v817_v35, %v738_v34 }
 0x3c7   : > { %1166 = vtanh.f32 %v818_v36 }
 0x3d1   : > { %v1167_v40 = vpop.eup %1166 }
 0x3d2   : > { %v827_v41 = vmul.f32 1.442695, %v1167_v40  ;;  %v831_v42 = vrot.slane %v1167_v40, 4 }
 0x3d4   : > { %1168 = vpow2.f32 %v827_v41  ;;  %v832_v44 = vadd.f32 %v1167_v40, %v831_v42 }
 0x3d6   : > { %v833_v45 = vrot.slane %v832_v44, 2 }
 0x3d8   : > { %v834_v47 = vadd.f32 %v833_v45, %v832_v44 }
 0x3da   : > { %v835_v48 = vrot.slane %v834_v47, 1 }
 0x3dc   : > { %v836_v50 = vadd.f32 %v835_v48, %v834_v47 }
 0x3de   : > { %v1169_v52 = vpop.eup %1168  ;;  %v837_v54 = vadd.f32 %v836_v50, %v566_v49 }
 0x3df   : > { %v829_v56 = vmul.f32 %v1169_v52, %v702_v51 }
 0x3e0   : > { %840 = vst [vmem:[%s297_s20] sm:$0x1] %v837_v54 }
 0x3e1   : > { %v830_v57 = vadd.f32 %v829_v56, %v823_v55 }
 0x3e2   : > { %1183 = shalt.err (!%p1180_p5)
}
 0x3e3   : > { %s1184_s20 = scalar_lea.hbm %s1501_s10, 16  ;;  %s1188_s25 = scalar_lea.hbm %s1581_s6, 32 }
 0x3e4   : > { %p1185_p7 = scmp.ne.s32.totalorder %s1501_s10, %s1184_s20  ;;  %p1189_p12 = scmp.lt.u32.totalorder %s1501_s10, %s1581_s6 }
 0x3e5   : > { %p1190_p13 = scmp.lt.u32.totalorder %s1188_s25, %s1184_s20  ;;  %p1192_p1 = scmp.lt.u32.totalorder %s1184_s20, %s1501_s10 }
 0x3e6   : > { %p1186_p10 = pnand %p1185_p7, %p1346_p6 }
 0x3e7   : > { %p1191_p0 = por %p1190_p13, %p1189_p12 }
 0x3e8   : > { %p1187_p11 = pneg %p1186_p10 }
 0x3e9   : > { %p1193_p2 = por %p1192_p1, %p1191_p0 }
 0x3eb   : > { %p1194_p3 = pnand %p1193_p2, %p1187_p11 }
 0x3ed   : > { %1197 = shalt.err (!%p1194_p3)
}
 0x3ee   : > { %1113 = dma.vmem_to_hbm [thread:$0]  (%p1346_p6), %s1503_s26, 16, %s1501_s10, %s847_s13   ;;  %839 = vst [vmem:[%s1483_s14 + $0x8] sm:$0xff] %v830_v57 }
 0x3ef   : > { %s842_s19 = scalar_lea.sflag [#allocation4], %s1365_s16  ;;  %s1198_s18 = scalar_lea.vmem %s1496_s17, 256 }
 0x3f0   : > { %p1199_p4 = scmp.ne.s32.totalorder %s1496_s17, %s1198_s18  ;;  %s1268_s29 = smov [#allocation3]  }
 0x3f1   : > { %s1202_s20 = sshll.u32 %s1268_s29, 4  ;;  %s1203_s20 = int_to_ptr.vmem [resolvable:$false] %s1202_s20 }
 0x3f2   : > { %p1200_p5 = pnand %p1199_p4, %p1346_p6  ;;  %s1204_s28 = scalar_lea.vmem %s1203_s20, 512 }
 0x3f3   : > { %p1205_p10 = scmp.lt.s32.totalorder %s1496_s17, %s1203_s20  ;;  %p1206_p11 = scmp.lt.s32.totalorder %s1204_s28, %s1198_s18 }
 0x3f4   : > { %p1201_p7 = pneg %p1200_p5 }
 0x3f5   : > { %p1207_p12 = por %p1206_p11, %p1205_p10 }
 0x3f7   : > { %p1208_p13 = pnand %p1207_p12, %p1201_p7 }
 0x3f9   : > { %1211 = shalt.err (!%p1208_p13)
}
 0x3fa   : > { %s1212_s14 = scalar_lea.hbm %s1508_s12, 256  ;;  %s1216_s13 = scalar_lea.hbm %s1580_s5, 512 }
 0x3fb   : > { %p1213_p0 = scmp.ne.s32.totalorder %s1508_s12, %s1212_s14  ;;  %p1217_p3 = scmp.lt.u32.totalorder %s1508_s12, %s1580_s5 }
 0x3fc   : > { %p1218_p4 = scmp.lt.u32.totalorder %s1216_s13, %s1212_s14  ;;  %p1220_p7 = scmp.lt.u32.totalorder %s1212_s14, %s1508_s12 }
 0x3fd   : > { %p1214_p1 = pnand %p1213_p0, %p1346_p6 }
 0x3fe   : > { %p1219_p5 = por %p1218_p4, %p1217_p3 }
 0x3ff   : > { %p1215_p2 = pneg %p1214_p1 }
 0x400   : > { %p1221_p10 = por %p1220_p7, %p1219_p5 }
 0x402   : > { %p1222_p11 = pnand %p1221_p10, %p1215_p2 }
 0x404   : > { %1225 = shalt.err (!%p1222_p11)
}
 0x405   : > { %s1269_s11 = smov 128   ;;  %s1270_s15 = smov 256  }
 0x406   : > { %s1271_s18 = smov 8  }
 0x407   : > { %1112 = dma.vmem_to_hbm [thread:$0]  (%p1346_p6), %s1496_s17, 256, %s1508_s12, %s842_s19, %s1269_s11, %s1270_s15, %s1271_s18  }
 0x408 PF: > { %s886_s29 = sand.u32 1, %s1252_s21   ;;  %p1117_p12 = pnand %p969_p9, %p1350_p8 }
 0x409   : > { %s887_s20 = scalar_lea.sflag [#allocation4], %s886_s29 }
 0x40a   : > { %1243 = dma.done.wait (!%p1117_p12), %s887_s20, 256  }
 0x40b   : > { %1245 = vsyncadd (!%p1117_p12), %s887_s20, 4294967040  ;;  %s896_s28 = scalar_lea.sflag [#allocation6], %s886_s29 }
 0x40c   : > { %1247 = dma.done.wait (!%p1117_p12), %s896_s28, 16  }
 0x40d   : > { %1249 = vsyncadd (!%p1117_p12), %s896_s28, 4294967280  ;;  %p20_p6 = scmp.ge.s32.totalorder %s1332_s27, 4   ;;  %s1584_s21 = smov %s1256_s22 }
 0x40e   : > { %s1585_s22 = smov %s1260_s23  ;;  %s1586_s23 = smov %s1344_s30 }
 0x40f   : > { %s1587_s24 = smov %s1332_s27  ;;  %22 = sbr.rel (!%p20_p6) target bundleno = 5 (0x5), region = 139 }
 0x416   :  { %900 = vsyncpa [#allocation4], 1 }
 0x417   :  { %902 = vsyncpa [#allocation4 + $0x1], 1 }
 0x418   :  { %903 = vsyncpa [#allocation6], 1 }
 0x419   :  { %905 = vsyncpa [#allocation6 + $0x1], 1 }

</bundles_post_ra>
